<compile_context>
chip_gen: v5e
topology: v5e:2x2
jax: 0.10.0
libtpu: 0.0.40
codegen_flags: <defaults>
</compile_context>

<pallas_src>
import functools

import jax
import jax.numpy as jnp
import numpy as np
from jax import lax
from jax.experimental import pallas as pl
from jax.experimental.pallas import tpu as pltpu

_NEG = -1e30  # finite "minus infinity": exp(_NEG - m) underflows to exactly 0


def _mil_kernel(tile_n,
                nvalid_ref,                       # scalar-prefetch (SMEM): true bag size
                x_ref,
                w1_ref, b1_ref, w2_ref, b2_ref,
                wa1_ref, ba1_ref, wa2_ref, ba2_ref,
                wc1_ref, bc1_ref, wc2_ref, bc2_ref,
                prob_ref, logit_ref,
                m_sc, l_sc, acc_sc):
    t = pl.program_id(0)
    n_valid = nvalid_ref[0]

    @pl.when(t == 0)
    def _init():
        m_sc[...] = jnp.full_like(m_sc, _NEG)
        l_sc[...] = jnp.zeros_like(l_sc)
        acc_sc[...] = jnp.zeros_like(acc_sc)

    # feature_ex: Linear(784,128) -> ReLU -> Linear(128,16).
    # x arrives straight from HBM; cast to bf16 here (free VPU op) so the MXU runs the
    # native bf16 path while accumulation stays f32.
    x = x_ref[...].astype(jnp.bfloat16)                                     # (TN, 784)
    h1 = jnp.dot(x, w1_ref[...], preferred_element_type=jnp.float32) + b1_ref[...]
    h1 = jnp.maximum(h1, 0.0)
    h = jnp.dot(h1.astype(jnp.bfloat16), w2_ref[...],
                preferred_element_type=jnp.float32) + b2_ref[...]           # (TN, 16)

    # Rows past the real bag size (partial last tile) hold unspecified VMEM data; zero
    # h *before* it feeds the attention / pooling path so no NaN/Inf can leak through.
    row = lax.broadcasted_iota(jnp.int32, (h.shape[0], 1), 0) + t * tile_n
    valid = row < n_valid                                                   # (TN, 1)
    h = jnp.where(valid, h, 0.0)

    # attention: Linear(16,8) -> ReLU -> Linear(8,1); the (TN,8)@(8,1) dot is a VPU
    # broadcast-mul + lane reduce (no MXU push for a lane-width-1 output).
    a1 = jnp.maximum(
        jnp.dot(h, wa1_ref[...], preferred_element_type=jnp.float32) + ba1_ref[...],
        0.0)                                                                # (TN, 8)
    logits = jnp.sum(a1 * wa2_ref[...], axis=-1, keepdims=True) + ba2_ref[...]
    logits = jnp.where(valid, logits, _NEG)                                 # (TN, 1)
    logit_ref[...] = logits                                                 # raw logits out

    # Online softmax + attention-weighted pooling over the instance axis.
    m_old = m_sc[...]                                                       # (1, 1)
    m_new = jnp.maximum(m_old, jnp.max(logits))
    alpha = jnp.exp(m_old - m_new)
    p = jnp.exp(logits - m_new)                                             # (TN, 1)
    l_sc[...] = alpha * l_sc[...] + jnp.sum(p)
    acc_sc[...] = alpha * acc_sc[...] + jnp.sum(p * h, axis=0, keepdims=True)
    m_sc[...] = m_new

    @pl.when(t == pl.num_programs(0) - 1)
    def _finalize():
        z = acc_sc[...] / l_sc[...]                                         # (1, 16)
        c1 = jnp.maximum(
            jnp.dot(z, wc1_ref[...], preferred_element_type=jnp.float32) + bc1_ref[...],
            0.0)                                                            # (1, 8)
        prob_ref[...] = jnp.dot(c1, wc2_ref[...],
                                preferred_element_type=jnp.float32) + bc2_ref[...]


def mil_forward(x, params, n_class, tile_n=1024, n_valid=None):
    """x: (1, N, 784); params: 12 arrays, weights stored (in, out).

    Returns (class_prob (1, n_class), a_n (1, n_valid)), matching the PyTorch module.
    Pass a fixed (padded) x plus the true bag size `n_valid` to reuse one compiled
    kernel across variable-size bags; padded rows may contain arbitrary garbage.
    """
    xs = jnp.squeeze(x, axis=0)                                             # (N, 784)
    n_total = xs.shape[0]
    if n_valid is None:
        n_valid = n_total
    assert 0 < n_valid <= n_total
    if n_total < 8:                          # only trivially small bags are padded
        xs = jnp.pad(xs, ((0, 8 - n_total), (0, 0)))
    n_rows, d = xs.shape

    # Tile so that every block *starts* in-bounds (the partial last block only extends
    # past the end and is masked in-kernel).  Large bags always use the fixed tile_n
    # block shape; tiny bags shrink to an 8-row multiple.
    tn = min(tile_n, 8 * (n_rows // 8))
    num_tiles = pl.cdiv(n_rows, tn)

    (w1, b1, w2, b2, wa1, ba1, wa2, ba2, wc1, bc1, wc2, bc2) = params

    args = (
        xs,                                            # streamed per tile (cast in-kernel)
        w1.astype(jnp.bfloat16), b1,                   # resident weights (bf16 halves DMA)
        w2.astype(jnp.bfloat16), b2,
        wa1, ba1,
        jnp.reshape(wa2, (1, wa2.shape[0])), ba2,      # (8,1) -> (1,8) row for VPU reduce
        wc1, bc1, wc2, bc2,
    )

    def resident(a):
        # Same block index every grid step -> DMA'd once, stays resident in VMEM.
        return pl.BlockSpec(a.shape, lambda t, nv: (0, 0))

    in_specs = ([pl.BlockSpec((tn, d), lambda t, nv: (t, 0))]
                + [resident(a) for a in args[1:]])

    out_shapes = (
        jax.ShapeDtypeStruct((1, n_class), jnp.float32),        # class_prob
        jax.ShapeDtypeStruct((num_tiles * tn, 1), jnp.float32),  # per-instance logits
    )
    out_specs = (
        pl.BlockSpec((1, n_class), lambda t, nv: (0, 0)),        # written on last step
        pl.BlockSpec((tn, 1), lambda t, nv: (t, 0)),
    )

    flops = 2 * n_rows * (784 * 128 + 128 * 16 + 16 * 8 + 8) + 2 * (16 * 8 + 8 * n_class)
    bytes_accessed = (int(xs.size) * xs.dtype.itemsize
                      + sum(int(a.size) * a.dtype.itemsize for a in args[1:])
                      + num_tiles * tn * 4 + n_class * 4)
    cost = pl.CostEstimate(flops=int(flops),
                           transcendentals=int(n_rows + 2 * num_tiles),
                           bytes_accessed=int(bytes_accessed))

    kernel = functools.partial(_mil_kernel, tn)

    prob, logits = pl.pallas_call(
        kernel,
        out_shape=out_shapes,
        grid_spec=pltpu.PrefetchScalarGridSpec(
            num_scalar_prefetch=1,                     # n_valid lives in SMEM
            grid=(num_tiles,),
            in_specs=in_specs,
            out_specs=out_specs,
            scratch_shapes=[
                pltpu.VMEM((1, 1), jnp.float32),       # running max
                pltpu.VMEM((1, 1), jnp.float32),       # running denom
                pltpu.VMEM((1, 16), jnp.float32),      # running weighted-h sum
            ]),
        compiler_params=pltpu.CompilerParams(
            dimension_semantics=("arbitrary",),        # instance axis is a reduction
            # f32-streamed 1024x784 tile double-buffered (~6.4 MiB) + in-kernel bf16
            # copy + intermediates: 32 MiB clears it on every generation (v5e default
            # is 16 MiB).  Bump if tile_n is raised to 2048-4096 for v7x.
            vmem_limit_bytes=32 * 1024 * 1024),
        cost_estimate=cost,
    )(jnp.array([n_valid], dtype=jnp.int32), *args)

    # (N,1) raw logits -> (1,N) softmax attention weights, lane-dense in the wrapper
    # (no in-kernel XLU transpose / masked 1-lane gymnastics needed).
    a_n = jax.nn.softmax(logits[:n_valid, 0][None, :], axis=1)
    return prob, a_n


def init_params(key, n_class):
    """Deterministic init mimicking nn.Linear shapes; weights stored (in, out)."""
    dims = [
        (784, 128), (128, 16),      # feature_ex
        (16, 8), (8, 1),            # attention
        (16, 8), (8, n_class),      # classifier
    ]
    params = []
    for (din, dout) in dims:
        key, kw, kb = jax.random.split(key, 3)
        bound = 1.0 / np.sqrt(din)
        w = jax.random.uniform(kw, (din, dout), jnp.float32, -bound, bound)
        b = jax.random.uniform(kb, (1, dout), jnp.float32, -bound, bound)
        params += [w, b]
    return tuple(params)


def mil_reference(x, params, n_class):
    """Pure-JAX reference with the same bf16 quantization of the feature path."""
    (w1, b1, w2, b2, wa1, ba1, wa2, ba2, wc1, bc1, wc2, bc2) = params
    xs = jnp.squeeze(x, axis=0)
    h1 = jnp.maximum(
        jnp.dot(xs.astype(jnp.bfloat16), w1.astype(jnp.bfloat16),
                preferred_element_type=jnp.float32) + b1, 0.0)
    h = jnp.dot(h1.astype(jnp.bfloat16), w2.astype(jnp.bfloat16),
                preferred_element_type=jnp.float32) + b2
    a = jnp.maximum(h @ wa1 + ba1, 0.0) @ wa2 + ba2                         # (N, 1)
    a_n = jax.nn.softmax(a.T, axis=1)                                       # (1, N)
    z = a_n @ h                                                             # (1, 16)
    prob = (jnp.maximum(z @ wc1 + bc1, 0.0) @ wc2 + bc2).reshape(1, n_class)
    return prob, a_n


def _assert_close(got, want):
    np.testing.assert_allclose(np.asarray(got), np.asarray(want), rtol=2e-3, atol=1e-4)


def _check(x, params, n_class):
    prob, attn = jax.block_until_ready(mil_forward(x, params, n_class))
    ref_prob, ref_attn = mil_reference(x, params, n_class)
    _assert_close(prob, ref_prob)
    _assert_close(attn, ref_attn)
    assert prob.shape == (1, n_class) and attn.shape == (1, x.shape[1])


if __name__ == "__main__":
    n_class = 2
    kparam, kx1, kx2, kx3 = jax.random.split(jax.random.PRNGKey(0), 4)
    params = init_params(kparam, n_class)

    # small bag: single exact tile
    _check(jax.random.normal(kx1, (1, 8, 784), dtype=jnp.float32), params, n_class)

    # medium bag: multi-tile path with a partial (masked) last tile + online softmax
    x300 = jax.random.normal(kx2, (1, 300, 784), dtype=jnp.float32)
    _check(x300, params, n_class)

    # same bag pre-padded to a fixed shape with runtime n_valid (compile-reuse path);
    # the pad rows are NaN on purpose to exercise the in-kernel masking.
    x_pad = jnp.concatenate(
        [x300, jnp.full((1, 84, 784), jnp.nan, dtype=jnp.float32)], axis=1)
    prob_p, attn_p = jax.block_until_ready(
        mil_forward(x_pad, params, n_class, n_valid=300))
    ref_prob, ref_attn = mil_reference(x300, params, n_class)
    _assert_close(prob_p, ref_prob)
    _assert_close(attn_p, ref_attn)

    # larger bag: fixed 1024-row streaming tiles
    _check(jax.random.normal(kx3, (1, 1200, 784), dtype=jnp.float32), params, n_class)

    print("KERNEL_OK")
</pallas_src>

<mosaic_0001>
module attributes {stable_mosaic.version = 11 : i64} {
  func.func @_mil_kernel(%arg0: i32, %arg1: memref<1xi32, #tpu.memory_space<smem>>, %arg2: memref<8x784xf32, #tpu.memory_space<vmem>>, %arg3: memref<784x128xbf16, #tpu.memory_space<vmem>>, %arg4: memref<1x128xf32, #tpu.memory_space<vmem>>, %arg5: memref<128x16xbf16, #tpu.memory_space<vmem>>, %arg6: memref<1x16xf32, #tpu.memory_space<vmem>>, %arg7: memref<16x8xf32, #tpu.memory_space<vmem>>, %arg8: memref<1x8xf32, #tpu.memory_space<vmem>>, %arg9: memref<1x8xf32, #tpu.memory_space<vmem>>, %arg10: memref<1x1xf32, #tpu.memory_space<vmem>>, %arg11: memref<16x8xf32, #tpu.memory_space<vmem>>, %arg12: memref<1x8xf32, #tpu.memory_space<vmem>>, %arg13: memref<8x2xf32, #tpu.memory_space<vmem>>, %arg14: memref<1x2xf32, #tpu.memory_space<vmem>>, %arg15: memref<1x2xf32, #tpu.memory_space<vmem>>, %arg16: memref<8x1xf32, #tpu.memory_space<vmem>>, %arg17: memref<1x1xf32, #tpu.memory_space<vmem>>, %arg18: memref<1x1xf32, #tpu.memory_space<vmem>>, %arg19: memref<1x16xf32, #tpu.memory_space<vmem>>) attributes {dimension_semantics = [#tpu.dimension_semantics<arbitrary>], iteration_bounds = array<i64: 1>, scalar_prefetch = 1 : i64, scratch_operands = 3 : i64, tpu.core_type = #tpu.core_type<tc>, window_params = [{transform_indices = @transform_0, window_bounds = array<i64: 8, 784>}, {pipeline_mode = #tpu.pipeline_mode<synchronous>, transform_indices = @transform_1, window_bounds = array<i64: 784, 128>}, {pipeline_mode = #tpu.pipeline_mode<synchronous>, transform_indices = @transform_2, window_bounds = array<i64: 1, 128>}, {pipeline_mode = #tpu.pipeline_mode<synchronous>, transform_indices = @transform_3, window_bounds = array<i64: 128, 16>}, {pipeline_mode = #tpu.pipeline_mode<synchronous>, transform_indices = @transform_4, window_bounds = array<i64: 1, 16>}, {pipeline_mode = #tpu.pipeline_mode<synchronous>, transform_indices = @transform_5, window_bounds = array<i64: 16, 8>}, {pipeline_mode = #tpu.pipeline_mode<synchronous>, transform_indices = @transform_6, window_bounds = array<i64: 1, 8>}, {pipeline_mode = #tpu.pipeline_mode<synchronous>, transform_indices = @transform_7, window_bounds = array<i64: 1, 8>}, {pipeline_mode = #tpu.pipeline_mode<synchronous>, transform_indices = @transform_8, window_bounds = array<i64: 1, 1>}, {pipeline_mode = #tpu.pipeline_mode<synchronous>, transform_indices = @transform_9, window_bounds = array<i64: 16, 8>}, {pipeline_mode = #tpu.pipeline_mode<synchronous>, transform_indices = @transform_10, window_bounds = array<i64: 1, 8>}, {pipeline_mode = #tpu.pipeline_mode<synchronous>, transform_indices = @transform_11, window_bounds = array<i64: 8, 2>}, {pipeline_mode = #tpu.pipeline_mode<synchronous>, transform_indices = @transform_12, window_bounds = array<i64: 1, 2>}, {pipeline_mode = #tpu.pipeline_mode<synchronous>, transform_indices = @transform_13, window_bounds = array<i64: 1, 2>}, {transform_indices = @transform_14, window_bounds = array<i64: 8, 1>}]} {
    %c0 = arith.constant 0 : index
    %0 = memref.load %arg1[%c0] : memref<1xi32, #tpu.memory_space<smem>>
    %c0_i32 = arith.constant 0 : i32
    %1 = arith.cmpi eq, %arg0, %c0_i32 : i32
    %2 = arith.extui %1 : i1 to i32
    %c0_i32_0 = arith.constant 0 : i32
    %3 = arith.cmpi ne, %2, %c0_i32_0 : i32
    scf.if %3 {
      %cst_45 = arith.constant -1.000000e+30 : f32
      %81 = vector.broadcast %cst_45 : f32 to vector<1x1xf32>
      %c0_46 = arith.constant 0 : index
      %c0_47 = arith.constant 0 : index
      %82 = vector.load %arg17[%c0_46, %c0_47] : memref<1x1xf32, #tpu.memory_space<vmem>>, vector<1x1xf32>
      tpu.vector_store %arg17[%c0_46, %c0_47], %81 {strides = array<i32>} : memref<1x1xf32, #tpu.memory_space<vmem>>, vector<1x1xf32>,
      %cst_48 = arith.constant 0.000000e+00 : f32
      %83 = vector.broadcast %cst_48 : f32 to vector<1x1xf32>
      %c0_49 = arith.constant 0 : index
      %c0_50 = arith.constant 0 : index
      %84 = vector.load %arg18[%c0_49, %c0_50] : memref<1x1xf32, #tpu.memory_space<vmem>>, vector<1x1xf32>
      tpu.vector_store %arg18[%c0_49, %c0_50], %83 {strides = array<i32>} : memref<1x1xf32, #tpu.memory_space<vmem>>, vector<1x1xf32>,
      %cst_51 = arith.constant 0.000000e+00 : f32
      %85 = vector.broadcast %cst_51 : f32 to vector<1x16xf32>
      %c0_52 = arith.constant 0 : index
      %c0_53 = arith.constant 0 : index
      %86 = vector.load %arg19[%c0_52, %c0_53] : memref<1x16xf32, #tpu.memory_space<vmem>>, vector<1x16xf32>
      tpu.vector_store %arg19[%c0_52, %c0_53], %85 {strides = array<i32>} : memref<1x16xf32, #tpu.memory_space<vmem>>, vector<1x16xf32>,
    } else {
    }
    %c0_1 = arith.constant 0 : index
    %c0_2 = arith.constant 0 : index
    %4 = vector.load %arg2[%c0_1, %c0_2] : memref<8x784xf32, #tpu.memory_space<vmem>>, vector<8x784xf32>
    %5 = arith.truncf %4 : vector<8x784xf32> to vector<8x784xbf16>
    %c0_3 = arith.constant 0 : index
    %c0_4 = arith.constant 0 : index
    %6 = vector.load %arg3[%c0_3, %c0_4] : memref<784x128xbf16, #tpu.memory_space<vmem>>, vector<784x128xbf16>
    %cst = arith.constant dense<0.000000e+00> : vector<8x128xf32>
    %7 = tpu.matmul %5, %6, %cst {dimension_numbers = #tpu.dot_dimension_numbers<[1], [0], [0], [1], [0, 0, 1, 1], [], []>} : vector<8x784xbf16>, vector<784x128xbf16>, vector<8x128xf32> -> vector<8x128xf32>
    %c0_5 = arith.constant 0 : index
    %c0_6 = arith.constant 0 : index
    %8 = vector.load %arg4[%c0_5, %c0_6] : memref<1x128xf32, #tpu.memory_space<vmem>>, vector<1x128xf32>
    %9 = vector.broadcast %8 : vector<1x128xf32> to vector<8x128xf32>
    %10 = arith.addf %7, %9 : vector<8x128xf32>
    %cst_7 = arith.constant 0.000000e+00 : f32
    %11 = vector.broadcast %cst_7 : f32 to vector<8x128xf32>
    %12 = arith.maximumf %10, %11 : vector<8x128xf32>
    %13 = arith.truncf %12 : vector<8x128xf32> to vector<8x128xbf16>
    %c0_8 = arith.constant 0 : index
    %c0_9 = arith.constant 0 : index
    %14 = vector.load %arg5[%c0_8, %c0_9] : memref<128x16xbf16, #tpu.memory_space<vmem>>, vector<128x16xbf16>
    %cst_10 = arith.constant dense<0.000000e+00> : vector<8x16xf32>
    %15 = tpu.matmul %13, %14, %cst_10 {dimension_numbers = #tpu.dot_dimension_numbers<[1], [0], [0], [1], [0, 0, 1, 1], [], []>} : vector<8x128xbf16>, vector<128x16xbf16>, vector<8x16xf32> -> vector<8x16xf32>
    %c0_11 = arith.constant 0 : index
    %c0_12 = arith.constant 0 : index
    %16 = vector.load %arg6[%c0_11, %c0_12] : memref<1x16xf32, #tpu.memory_space<vmem>>, vector<1x16xf32>
    %17 = vector.broadcast %16 : vector<1x16xf32> to vector<8x16xf32>
    %18 = arith.addf %15, %17 : vector<8x16xf32>
    %19 = tpu.iota {dimensions = array<i32: 0>} : vector<8x1xi32>
    %c8_i32 = arith.constant 8 : i32
    %20 = arith.muli %arg0, %c8_i32 : i32
    %21 = vector.broadcast %20 : i32 to vector<8x1xi32>
    %22 = arith.addi %19, %21 : vector<8x1xi32>
    %23 = vector.broadcast %0 : i32 to vector<8x1xi32>
    %24 = arith.cmpi slt, %22, %23 : vector<8x1xi32>
    %cst_13 = arith.constant 0.000000e+00 : f32
    %25 = vector.shape_cast %24 : vector<8x1xi1> to vector<8x1xi1>
    %26 = vector.broadcast %25 : vector<8x1xi1> to vector<8x16xi1>
    %27 = vector.broadcast %cst_13 : f32 to vector<8x16xf32>
    %28 = arith.select %26, %18, %27 : vector<8x16xi1>, vector<8x16xf32>
    %c0_14 = arith.constant 0 : index
    %c0_15 = arith.constant 0 : index
    %29 = vector.load %arg7[%c0_14, %c0_15] : memref<16x8xf32, #tpu.memory_space<vmem>>, vector<16x8xf32>
    %cst_16 = arith.constant dense<0.000000e+00> : vector<8x8xf32>
    %30 = tpu.matmul %28, %29, %cst_16 {dimension_numbers = #tpu.dot_dimension_numbers<[1], [0], [0], [1], [0, 0, 1, 1], [], []>} : vector<8x16xf32>, vector<16x8xf32>, vector<8x8xf32> -> vector<8x8xf32>
    %c0_17 = arith.constant 0 : index
    %c0_18 = arith.constant 0 : index
    %31 = vector.load %arg8[%c0_17, %c0_18] : memref<1x8xf32, #tpu.memory_space<vmem>>, vector<1x8xf32>
    %32 = vector.broadcast %31 : vector<1x8xf32> to vector<8x8xf32>
    %33 = arith.addf %30, %32 : vector<8x8xf32>
    %cst_19 = arith.constant 0.000000e+00 : f32
    %34 = vector.broadcast %cst_19 : f32 to vector<8x8xf32>
    %35 = arith.maximumf %33, %34 : vector<8x8xf32>
    %c0_20 = arith.constant 0 : index
    %c0_21 = arith.constant 0 : index
    %36 = vector.load %arg9[%c0_20, %c0_21] : memref<1x8xf32, #tpu.memory_space<vmem>>, vector<1x8xf32>
    %37 = vector.broadcast %36 : vector<1x8xf32> to vector<8x8xf32>
    %38 = arith.mulf %35, %37 : vector<8x8xf32>
    %cst_22 = arith.constant dense<0.000000e+00> : vector<8xf32>
    %39 = vector.multi_reduction <add>, %38, %cst_22 [1] : vector<8x8xf32> to vector<8xf32>
    %40 = vector.shape_cast %39 : vector<8xf32> to vector<8x1xf32>
    %c0_23 = arith.constant 0 : index
    %c0_24 = arith.constant 0 : index
    %41 = vector.load %arg10[%c0_23, %c0_24] : memref<1x1xf32, #tpu.memory_space<vmem>>, vector<1x1xf32>
    %42 = vector.broadcast %41 : vector<1x1xf32> to vector<8x1xf32>
    %43 = arith.addf %40, %42 : vector<8x1xf32>
    %cst_25 = arith.constant -1.000000e+30 : f32
    %44 = vector.broadcast %cst_25 : f32 to vector<8x1xf32>
    %45 = arith.select %24, %43, %44 : vector<8x1xi1>, vector<8x1xf32>
    %c0_26 = arith.constant 0 : index
    %c0_27 = arith.constant 0 : index
    %46 = vector.load %arg16[%c0_26, %c0_27] : memref<8x1xf32, #tpu.memory_space<vmem>>, vector<8x1xf32>
    tpu.vector_store %arg16[%c0_26, %c0_27], %45 {strides = array<i32>} : memref<8x1xf32, #tpu.memory_space<vmem>>, vector<8x1xf32>,
    %c0_28 = arith.constant 0 : index
    %c0_29 = arith.constant 0 : index
    %47 = vector.load %arg17[%c0_28, %c0_29] : memref<1x1xf32, #tpu.memory_space<vmem>>, vector<1x1xf32>
    %48 = vector.shape_cast %45 : vector<8x1xf32> to vector<1x8x1xf32>
    %cst_30 = arith.constant dense<0xFF800000> : vector<1xf32>
    %49 = vector.multi_reduction <maximumf>, %48, %cst_30 [1, 2] : vector<1x8x1xf32> to vector<1xf32>
    %50 = vector.shape_cast %49 : vector<1xf32> to vector<1x1x1xf32>
    %51 = vector.extract %50[0, 0, 0] : f32 from vector<1x1x1xf32>
    %52 = vector.broadcast %51 : f32 to vector<1x1xf32>
    %53 = arith.maximumf %47, %52 : vector<1x1xf32>
    %54 = arith.subf %47, %53 : vector<1x1xf32>
    %55 = math.exp %54 : vector<1x1xf32>
    %56 = vector.broadcast %53 : vector<1x1xf32> to vector<8x1xf32>
    %57 = arith.subf %45, %56 : vector<8x1xf32>
    %58 = math.exp %57 : vector<8x1xf32>
    %c0_31 = arith.constant 0 : index
    %c0_32 = arith.constant 0 : index
    %59 = vector.load %arg18[%c0_31, %c0_32] : memref<1x1xf32, #tpu.memory_space<vmem>>, vector<1x1xf32>
    %60 = arith.mulf %55, %59 : vector<1x1xf32>
    %61 = vector.shape_cast %58 : vector<8x1xf32> to vector<1x8x1xf32>
    %cst_33 = arith.constant dense<0.000000e+00> : vector<1xf32>
    %62 = vector.multi_reduction <add>, %61, %cst_33 [1, 2] : vector<1x8x1xf32> to vector<1xf32>
    %63 = vector.shape_cast %62 : vector<1xf32> to vector<1x1x1xf32>
    %64 = vector.extract %63[0, 0, 0] : f32 from vector<1x1x1xf32>
    %65 = vector.broadcast %64 : f32 to vector<1x1xf32>
    %66 = arith.addf %60, %65 : vector<1x1xf32>
    %c0_34 = arith.constant 0 : index
    %c0_35 = arith.constant 0 : index
    %67 = vector.load %arg18[%c0_34, %c0_35] : memref<1x1xf32, #tpu.memory_space<vmem>>, vector<1x1xf32>
    tpu.vector_store %arg18[%c0_34, %c0_35], %66 {strides = array<i32>} : memref<1x1xf32, #tpu.memory_space<vmem>>, vector<1x1xf32>,
    %c0_36 = arith.constant 0 : index
    %c0_37 = arith.constant 0 : index
    %68 = vector.load %arg19[%c0_36, %c0_37] : memref<1x16xf32, #tpu.memory_space<vmem>>, vector<1x16xf32>
    %69 = vector.broadcast %55 : vector<1x1xf32> to vector<1x16xf32>
    %70 = arith.mulf %69, %68 : vector<1x16xf32>
    %71 = vector.broadcast %58 : vector<8x1xf32> to vector<8x16xf32>
    %72 = arith.mulf %71, %28 : vector<8x16xf32>
    %cst_38 = arith.constant dense<0.000000e+00> : vector<16xf32>
    %73 = vector.multi_reduction <add>, %72, %cst_38 [0] : vector<8x16xf32> to vector<16xf32>
    %74 = vector.shape_cast %73 : vector<16xf32> to vector<1x16xf32>
    %75 = arith.addf %70, %74 : vector<1x16xf32>
    %c0_39 = arith.constant 0 : index
    %c0_40 = arith.constant 0 : index
    %76 = vector.load %arg19[%c0_39, %c0_40] : memref<1x16xf32, #tpu.memory_space<vmem>>, vector<1x16xf32>
    tpu.vector_store %arg19[%c0_39, %c0_40], %75 {strides = array<i32>} : memref<1x16xf32, #tpu.memory_space<vmem>>, vector<1x16xf32>,
    %c0_41 = arith.constant 0 : index
    %c0_42 = arith.constant 0 : index
    %77 = vector.load %arg17[%c0_41, %c0_42] : memref<1x1xf32, #tpu.memory_space<vmem>>, vector<1x1xf32>
    tpu.vector_store %arg17[%c0_41, %c0_42], %53 {strides = array<i32>} : memref<1x1xf32, #tpu.memory_space<vmem>>, vector<1x1xf32>,
    %c0_i32_43 = arith.constant 0 : i32
    %78 = arith.cmpi eq, %arg0, %c0_i32_43 : i32
    %79 = arith.extui %78 : i1 to i32
    %c0_i32_44 = arith.constant 0 : i32
    %80 = arith.cmpi ne, %79, %c0_i32_44 : i32
    scf.if %80 {
      %c0_45 = arith.constant 0 : index
      %c0_46 = arith.constant 0 : index
      %81 = vector.load %arg19[%c0_45, %c0_46] : memref<1x16xf32, #tpu.memory_space<vmem>>, vector<1x16xf32>
      %c0_47 = arith.constant 0 : index
      %c0_48 = arith.constant 0 : index
      %82 = vector.load %arg18[%c0_47, %c0_48] : memref<1x1xf32, #tpu.memory_space<vmem>>, vector<1x1xf32>
      %83 = vector.broadcast %82 : vector<1x1xf32> to vector<1x16xf32>
      %84 = arith.divf %81, %83 : vector<1x16xf32>
      %c0_49 = arith.constant 0 : index
      %c0_50 = arith.constant 0 : index
      %85 = vector.load %arg11[%c0_49, %c0_50] : memref<16x8xf32, #tpu.memory_space<vmem>>, vector<16x8xf32>
      %cst_51 = arith.constant dense<0.000000e+00> : vector<1x8xf32>
      %86 = tpu.matmul %84, %85, %cst_51 {dimension_numbers = #tpu.dot_dimension_numbers<[1], [0], [0], [1], [0, 0, 1, 1], [], []>} : vector<1x16xf32>, vector<16x8xf32>, vector<1x8xf32> -> vector<1x8xf32>
      %c0_52 = arith.constant 0 : index
      %c0_53 = arith.constant 0 : index
      %87 = vector.load %arg12[%c0_52, %c0_53] : memref<1x8xf32, #tpu.memory_space<vmem>>, vector<1x8xf32>
      %88 = arith.addf %86, %87 : vector<1x8xf32>
      %cst_54 = arith.constant 0.000000e+00 : f32
      %89 = vector.broadcast %cst_54 : f32 to vector<1x8xf32>
      %90 = arith.maximumf %88, %89 : vector<1x8xf32>
      %c0_55 = arith.constant 0 : index
      %c0_56 = arith.constant 0 : index
      %91 = vector.load %arg13[%c0_55, %c0_56] : memref<8x2xf32, #tpu.memory_space<vmem>>, vector<8x2xf32>
      %cst_57 = arith.constant dense<0.000000e+00> : vector<1x2xf32>
      %92 = tpu.matmul %90, %91, %cst_57 {dimension_numbers = #tpu.dot_dimension_numbers<[1], [0], [0], [1], [0, 0, 1, 1], [], []>} : vector<1x8xf32>, vector<8x2xf32>, vector<1x2xf32> -> vector<1x2xf32>
      %c0_58 = arith.constant 0 : index
      %c0_59 = arith.constant 0 : index
      %93 = vector.load %arg14[%c0_58, %c0_59] : memref<1x2xf32, #tpu.memory_space<vmem>>, vector<1x2xf32>
      %94 = arith.addf %92, %93 : vector<1x2xf32>
      %c0_60 = arith.constant 0 : index
      %c0_61 = arith.constant 0 : index
      %95 = vector.load %arg15[%c0_60, %c0_61] : memref<1x2xf32, #tpu.memory_space<vmem>>, vector<1x2xf32>
      tpu.vector_store %arg15[%c0_60, %c0_61], %94 {strides = array<i32>} : memref<1x2xf32, #tpu.memory_space<vmem>>, vector<1x2xf32>,
    } else {
    }
    return
  }
  func.func @transform_0(%arg0: i32, %arg1: memref<1xi32, #tpu.memory_space<smem>>) -> (i32, i32) {
    %c0_i32 = arith.constant 0 : i32
    %c0_i32_0 = arith.constant 0 : i32
    return %arg0, %c0_i32 : i32, i32
  }
  func.func @transform_1(%arg0: i32, %arg1: memref<1xi32, #tpu.memory_space<smem>>) -> (i32, i32) {
    %c0_i32 = arith.constant 0 : i32
    %c0_i32_0 = arith.constant 0 : i32
    %c0_i32_1 = arith.constant 0 : i32
    return %c0_i32, %c0_i32_0 : i32, i32
  }
  func.func @transform_2(%arg0: i32, %arg1: memref<1xi32, #tpu.memory_space<smem>>) -> (i32, i32) {
    %c0_i32 = arith.constant 0 : i32
    %c0_i32_0 = arith.constant 0 : i32
    %c0_i32_1 = arith.constant 0 : i32
    return %c0_i32, %c0_i32_0 : i32, i32
  }
  func.func @transform_3(%arg0: i32, %arg1: memref<1xi32, #tpu.memory_space<smem>>) -> (i32, i32) {
    %c0_i32 = arith.constant 0 : i32
    %c0_i32_0 = arith.constant 0 : i32
    %c0_i32_1 = arith.constant 0 : i32
    return %c0_i32, %c0_i32_0 : i32, i32
  }
  func.func @transform_4(%arg0: i32, %arg1: memref<1xi32, #tpu.memory_space<smem>>) -> (i32, i32) {
    %c0_i32 = arith.constant 0 : i32
    %c0_i32_0 = arith.constant 0 : i32
    %c0_i32_1 = arith.constant 0 : i32
    return %c0_i32, %c0_i32_0 : i32, i32
  }
  func.func @transform_5(%arg0: i32, %arg1: memref<1xi32, #tpu.memory_space<smem>>) -> (i32, i32) {
    %c0_i32 = arith.constant 0 : i32
    %c0_i32_0 = arith.constant 0 : i32
    %c0_i32_1 = arith.constant 0 : i32
    return %c0_i32, %c0_i32_0 : i32, i32
  }
  func.func @transform_6(%arg0: i32, %arg1: memref<1xi32, #tpu.memory_space<smem>>) -> (i32, i32) {
    %c0_i32 = arith.constant 0 : i32
    %c0_i32_0 = arith.constant 0 : i32
    %c0_i32_1 = arith.constant 0 : i32
    return %c0_i32, %c0_i32_0 : i32, i32
  }
  func.func @transform_7(%arg0: i32, %arg1: memref<1xi32, #tpu.memory_space<smem>>) -> (i32, i32) {
    %c0_i32 = arith.constant 0 : i32
    %c0_i32_0 = arith.constant 0 : i32
    %c0_i32_1 = arith.constant 0 : i32
    return %c0_i32, %c0_i32_0 : i32, i32
  }
  func.func @transform_8(%arg0: i32, %arg1: memref<1xi32, #tpu.memory_space<smem>>) -> (i32, i32) {
    %c0_i32 = arith.constant 0 : i32
    %c0_i32_0 = arith.constant 0 : i32
    %c0_i32_1 = arith.constant 0 : i32
    return %c0_i32, %c0_i32_0 : i32, i32
  }
  func.func @transform_9(%arg0: i32, %arg1: memref<1xi32, #tpu.memory_space<smem>>) -> (i32, i32) {
    %c0_i32 = arith.constant 0 : i32
    %c0_i32_0 = arith.constant 0 : i32
    %c0_i32_1 = arith.constant 0 : i32
    return %c0_i32, %c0_i32_0 : i32, i32
  }
  func.func @transform_10(%arg0: i32, %arg1: memref<1xi32, #tpu.memory_space<smem>>) -> (i32, i32) {
    %c0_i32 = arith.constant 0 : i32
    %c0_i32_0 = arith.constant 0 : i32
    %c0_i32_1 = arith.constant 0 : i32
    return %c0_i32, %c0_i32_0 : i32, i32
  }
  func.func @transform_11(%arg0: i32, %arg1: memref<1xi32, #tpu.memory_space<smem>>) -> (i32, i32) {
    %c0_i32 = arith.constant 0 : i32
    %c0_i32_0 = arith.constant 0 : i32
    %c0_i32_1 = arith.constant 0 : i32
    return %c0_i32, %c0_i32_0 : i32, i32
  }
  func.func @transform_12(%arg0: i32, %arg1: memref<1xi32, #tpu.memory_space<smem>>) -> (i32, i32) {
    %c0_i32 = arith.constant 0 : i32
    %c0_i32_0 = arith.constant 0 : i32
    %c0_i32_1 = arith.constant 0 : i32
    return %c0_i32, %c0_i32_0 : i32, i32
  }
  func.func @transform_13(%arg0: i32, %arg1: memref<1xi32, #tpu.memory_space<smem>>) -> (i32, i32) {
    %c0_i32 = arith.constant 0 : i32
    %c0_i32_0 = arith.constant 0 : i32
    %c0_i32_1 = arith.constant 0 : i32
    return %c0_i32, %c0_i32_0 : i32, i32
  }
  func.func @transform_14(%arg0: i32, %arg1: memref<1xi32, #tpu.memory_space<smem>>) -> (i32, i32) {
    %c0_i32 = arith.constant 0 : i32
    %c0_i32_0 = arith.constant 0 : i32
    return %arg0, %c0_i32 : i32, i32
  }
}

</mosaic_0001>

<bundles_post_ra>
// kernel: tpu_custom_call.1
= control target key start
LH: loop header
LB: loop body
LE: loop exit
PB: predicated region body
PF: predicated region fallthrough
CT: control target
= control target key end

     0   :  { %s1460_s0 = inlined_call_operand.<no memory space> [shape: s32[1], index: 0, kind: input, shape index: {}]   ;;  %s1461_s1 = inlined_call_operand.vmem [shape: f32[8,784], index: 1, kind: input, shape index: {}]   ;;  %s1462_s2 = inlined_call_operand.hbm [shape: bf16[784,128], index: 2, kind: input, shape index: {}]   ;;  %s1463_s3 = inlined_call_operand.vmem [shape: f32[1,128], index: 3, kind: input, shape index: {}]   ;;  %s1464_s4 = inlined_call_operand.vmem [shape: bf16[128,16], index: 4, kind: input, shape index: {}]   ;;  %s1465_s5 = inlined_call_operand.vmem [shape: f32[1,16], index: 5, kind: input, shape index: {}]   ;;  %s1466_s6 = inlined_call_operand.vmem [shape: f32[16,8], index: 6, kind: input, shape index: {}]   ;;  %s1467_s7 = inlined_call_operand.vmem [shape: f32[1,8], index: 7, kind: input, shape index: {}]   ;;  %s1468_s8 = inlined_call_operand.vmem [shape: f32[1,8], index: 8, kind: input, shape index: {}]   ;;  %s1469_s9 = inlined_call_operand.<no memory space> [shape: f32[1,1], index: 9, kind: input, shape index: {}]   ;;  %s1470_s10 = inlined_call_operand.vmem [shape: f32[16,8], index: 10, kind: input, shape index: {}]   ;;  %s1471_s11 = inlined_call_operand.vmem [shape: f32[1,8], index: 11, kind: input, shape index: {}]   ;;  %s1472_s12 = inlined_call_operand.vmem [shape: f32[8,2], index: 12, kind: input, shape index: {}]   ;;  %s1473_s13 = inlined_call_operand.vmem [shape: f32[1,2], index: 13, kind: input, shape index: {}]   ;;  %s1474_s14 = inlined_call_operand.hbm [shape: f32[1,2], index: 14, kind: output, shape index: {0}]   ;;  %s1475_s15 = inlined_call_operand.vmem [shape: f32[8,1], index: 15, kind: output, shape index: {1}]  }
   0x1   :  { %v22_v0 = vstv %s1469_s9 }
   0x2   :  { %23 = vst [vmem:[#allocation7] sm:$0x1] %v22_v0 }
   0x3   :  { %24 = vsyncpa [#allocation9], 0 }
   0x4   :  { %25 = vsyncpa [#allocation10], 0  ;;  %s32_s22 = sshll.u32 %s1462_s2, 4  ;;  %s1253_s23 = smov [#allocation8]   ;;  %s33_s22 = int_to_ptr.hbm [resolvable:$true] %s32_s22 }
   0x5   :  { %s34_s24 = sshll.u32 %s1253_s23, 4  ;;  %s1254_s25 = smov 64   ;;  %s35_s24 = int_to_ptr.vmem [resolvable:$true] %s34_s24 }
   0x6   :  { %s1255_s26 = smov 4  }
   0x7   :  { %40 = dma.hbm_to_vmem [thread:$0]  %s33_s22, 6272, %s35_s24, [#allocation9], %s1254_s25, %s1254_s25, %s1255_s26  }
   0x8   :  { %1249 = dma.done.wait [#allocation9], 6272  }
   0x9   :  { %1250 = vsyncadd [#allocation9], 4294961024  ;;  %v1126_v1 = vld [vmem:[#allocation8 + $0x38] sm:$0xff]  ;;  %v1125_v4 = vld [vmem:[#allocation8 + $0x30] sm:$0xff]  ;;  %vm488_vm0 = vcmask 130048   ;;  %vm711_vm2 = vcmask 64512  }
   0xa   :  { %v1134_v2 = vld [vmem:[#allocation8 + $0x78] sm:$0xff]  ;;  %492 = vmatpush.bf16.msra.mxu0 %v1126_v1  ;;  %v1133_v5 = vld [vmem:[#allocation8 + $0x70] sm:$0xff]  ;;  %v1124_v9 = vld [vmem:[#allocation8 + $0x28] sm:$0xff]  ;;  %vm721_vm3 = vcmask 7168   ;;  %vm73_vm4 = vcmask 0   ;;  %vm76_vm5 = vcmask 122880  }
   0xb   :  { %v1142_v3 = vld [vmem:[#allocation8 + $0xb8] sm:$0xff]  ;;  %505 = vmatpush.bf16.msra.mxu1 %v1134_v2  ;;  %v1141_v6 = vld [vmem:[#allocation8 + $0xb0] sm:$0xff]  ;;  %v1132_v10 = vld [vmem:[#allocation8 + $0x68] sm:$0xff]  ;;  %s1259_s22 = smov [#allocation11]   ;;  %s873_s26 = sshll.u32 %s1474_s14, 4  ;;  %vm864_vm10 = vcmask 8192   ;;  %s874_s26 = int_to_ptr.hbm [resolvable:$true] %s873_s26 }
   0xc   :  { %518 = vmatpush.bf16.msra.mxu2 %v1142_v3  ;;  %v1150_v7 = vld [vmem:[#allocation8 + $0xf8] sm:$0xff]  ;;  %v1149_v8 = vld [vmem:[#allocation8 + $0xf0] sm:$0xff]  ;;  %v1140_v11 = vld [vmem:[#allocation8 + $0xa8] sm:$0xff]  ;;  %s871_s23 = sshll.u32 %s1259_s22, 4  ;;  %s872_s23 = int_to_ptr.vmem [resolvable:$true] %s871_s23 }
   0xd   :  { %531 = vmatpush.bf16.msra.mxu3 %v1150_v7  ;;  %v1148_v12 = vld [vmem:[#allocation8 + $0xe8] sm:$0xff]  ;;  %v1123_v13 = vld [vmem:[#allocation8 + $0x20] sm:$0xff]  ;;  %v1122_v17 = vld [vmem:[#allocation8 + $0x18] sm:$0xff] }
   0xe   :  { %493 = vmatpush.bf16.msra.mxu0 %v1125_v4  ;;  %v1131_v14 = vld [vmem:[#allocation8 + $0x60] sm:$0xff]  ;;  %v1130_v18 = vld [vmem:[#allocation8 + $0x58] sm:$0xff]  ;;  %v1121_v21 = vld [vmem:[#allocation8 + $0x10] sm:$0xff] }
   0xf   :  { %506 = vmatpush.bf16.msra.mxu1 %v1133_v5  ;;  %v1139_v15 = vld [vmem:[#allocation8 + $0xa0] sm:$0xff]  ;;  %v1138_v19 = vld [vmem:[#allocation8 + $0x98] sm:$0xff]  ;;  %v1129_v22 = vld [vmem:[#allocation8 + $0x50] sm:$0xff] }
  0x10   :  { %519 = vmatpush.bf16.msra.mxu2 %v1141_v6  ;;  %v1147_v16 = vld [vmem:[#allocation8 + $0xe0] sm:$0xff]  ;;  %v1146_v20 = vld [vmem:[#allocation8 + $0xd8] sm:$0xff]  ;;  %v1137_v23 = vld [vmem:[#allocation8 + $0x90] sm:$0xff] }
  0x11   :  { %532 = vmatpush.bf16.msra.mxu3 %v1149_v8  ;;  %v1145_v24 = vld [vmem:[#allocation8 + $0xd0] sm:$0xff]  ;;  %v1120_v25 = vld [vmem:[#allocation8 + $0x8] sm:$0xff]  ;;  %v1119_v28 = vld [vmem:[#allocation8] sm:$0xff] }
  0x12   :  { %494 = vmatpush.bf16.msra.mxu0 %v1124_v9  ;;  %v1128_v26 = vld [vmem:[#allocation8 + $0x48] sm:$0xff]  ;;  %v1127_v30 = vld [vmem:[#allocation8 + $0x40] sm:$0xff]  ;;  %v1158_v33 = vld [vmem:[#allocation8 + $0x138] sm:$0xff] }
  0x13   :  { %507 = vmatpush.bf16.msra.mxu1 %v1132_v10  ;;  %v1136_v27 = vld [vmem:[#allocation8 + $0x88] sm:$0xff]  ;;  %v78_v31 = vld [vmem:[%s1461_s1] sm:$0xff]  ;;  %v81_v41 = vld [vmem:[%s1461_s1 + $0x18] sm:$0xff] }
  0x14   :  { %520 = vmatpush.bf16.msra.mxu2 %v1140_v11  ;;  %v1144_v29 = vld [vmem:[#allocation8 + $0xc8] sm:$0xff]  ;;  %v1166_v34 = vld [vmem:[#allocation8 + $0x178] sm:$0xff]  ;;  %v1135_v35 = vld [vmem:[#allocation8 + $0x80] sm:$0xff]  ;;  %v85_v37 = vpack.c.bf16 %v78_v31, %v78_v31  ;;  %v88_v45 = vpack.c.bf16 %v81_v41, %v81_v41 }
  0x15   :  { %533 = vmatpush.bf16.msra.mxu3 %v1148_v12  ;;  %v79_v32 = vld [vmem:[%s1461_s1 + $0x8] sm:$0xff]  ;;  %v80_v36 = vld [vmem:[%s1461_s1 + $0x10] sm:$0xff]  ;;  %v1154_v50 = vld [vmem:[#allocation8 + $0x118] sm:$0xff] }
  0x16   :  { %495 = vmatpush.bf16.msra.mxu0 %v1123_v13  ;;  %v86_v38 = vpack.c.bf16 %v79_v32, %v79_v32  ;;  %v1143_v39 = vld [vmem:[#allocation8 + $0xc0] sm:$0xff]  ;;  %v1157_v42 = vld [vmem:[#allocation8 + $0x130] sm:$0xff]  ;;  %v87_v44 = vpack.c.bf16 %v80_v36, %v80_v36  ;;  %v1156_v46 = vld [vmem:[#allocation8 + $0x128] sm:$0xff] }
  0x17   :  { %508 = vmatpush.bf16.msra.mxu1 %v1131_v14  ;;  %v1167_v40 = vld [vmem:[#allocation8 + $0x180] sm:$0xff]  ;;  %v1165_v43 = vld [vmem:[#allocation8 + $0x170] sm:$0xff]  ;;  %v1164_v47 = vld [vmem:[#allocation8 + $0x168] sm:$0xff] }
  0x18   :  { %521 = vmatpush.bf16.msra.mxu2 %v1139_v15  ;;  %v1155_v48 = vld [vmem:[#allocation8 + $0x120] sm:$0xff]  ;;  %v1162_v51 = vld [vmem:[#allocation8 + $0x158] sm:$0xff]  ;;  %v84_v52 = vld [vmem:[%s1461_s1 + $0x30] sm:$0xff] }
  0x19   :  { %534 = vmatpush.bf16.msra.mxu3 %v1147_v16  ;;  %v1163_v49 = vld [vmem:[#allocation8 + $0x160] sm:$0xff]  ;;  %v1153_v53 = vld [vmem:[#allocation8 + $0x110] sm:$0xff]  ;;  %v91_v55 = vpack.c.bf16 %v84_v52, %v84_v52  ;;  %v1152_v56 = vld [vmem:[#allocation8 + $0x108] sm:$0xff] }
  0x1a   :  { %496 = vmatpush.bf16.msra.mxu0 %v1122_v17  ;;  %v1161_v54 = vld [vmem:[#allocation8 + $0x150] sm:$0xff]  ;;  %v1160_v57 = vld [vmem:[#allocation8 + $0x148] sm:$0xff]  ;;  %v1151_v58 = vld [vmem:[#allocation8 + $0x100] sm:$0xff] }
  0x1b   :  { %509 = vmatpush.bf16.msra.mxu1 %v1130_v18  ;;  %v1159_v59 = vld [vmem:[#allocation8 + $0x140] sm:$0xff]  ;;  %v1175_v0 = vld [vmem:[%s1464_s4 + $0x38] sm:$0xff]  ;;  %v1174_v1 = vld [vmem:[%s1464_s4 + $0x30] sm:$0xff] }
  0x1c   :  { %522 = vmatpush.bf16.msra.mxu2 %v1138_v19  ;;  %v82_v60 = vld [vmem:[%s1461_s1 + $0x20] sm:$0xff]  ;;  %v83_v61 = vld [vmem:[%s1461_s1 + $0x28] sm:$0xff]  ;;  %v1171_v4 = vld [vmem:[%s1464_s4 + $0x18] sm:$0xff] }
  0x1d   :  { %535 = vmatpush.bf16.msra.mxu3 %v1146_v20  ;;  %v89_v62 = vpack.c.bf16 %v82_v60, %v82_v60  ;;  %v90_v63 = vpack.c.bf16 %v83_v61, %v83_v61  ;;  %v1173_v2 = vld [vmem:[%s1464_s4 + $0x28] sm:$0xff]  ;;  %v1172_v3 = vld [vmem:[%s1464_s4 + $0x20] sm:$0xff]  ;;  %v1170_v5 = vld [vmem:[%s1464_s4 + $0x10] sm:$0xff] }
  0x1e   :  { %497 = vmatpush.bf16.msra.mxu0 %v1121_v21  ;;  %v1169_v6 = vld [vmem:[%s1464_s4 + $0x8] sm:$0xff]  ;;  %v1168_v9 = vld [vmem:[%s1464_s4] sm:$0xff] }
  0x1f   :  { %510 = vmatpush.bf16.msra.mxu1 %v1129_v22  ;;  %v677_v12 = vld [vmem:[%s1466_s6 + $0x8] sm:$0xff]  ;;  %v676_v13 = vld [vmem:[%s1466_s6] sm:$0xff] }
  0x20   :  { %523 = vmatpush.bf16.msra.mxu2 %v1137_v23  ;;  %v1190_v16 = vld [vmem:[%s1463_s3] ss:$0 sm:$0xff] }
  0x21   :  { %536 = vmatpush.bf16.msra.mxu3 %v1145_v24  ;;  %v1191_v36 = vld [vmem:[%s1465_s5] ss:$0 sm:$0xff] }
  0x22   :  { %498 = vmatpush.bf16.msra.mxu0 %v1120_v25 }
  0x23   :  { %511 = vmatpush.bf16.msra.mxu1 %v1128_v26 }
  0x24   :  { %524 = vmatpush.bf16.msra.mxu2 %v1136_v27 }
  0x25   :  { %537 = vmatpush.bf16.msra.mxu3 %v1144_v29 }
  0x26   :  { %499 = vmatpush.bf16.msra.mxu0 %v1119_v28 }
  0x27   :  { %512 = vmatpush.bf16.msra.mxu1 %v1127_v30 }
  0x28   :  { %525 = vmatpush.bf16.msra.mxu2 %v1135_v35 }
  0x29   :  { %500 = vmatmul.bf16.vlgmr.msra.gmra.mxu0 %v85_v37  ;;  %538 = vmatpush.bf16.msra.mxu3 %v1143_v39  ;;  %v671_v37 = vstv %s1460_s0 }
  0x2a   :  { %544 = vmatpush.bf16.msrb.mxu0 %v1158_v33  ;;  %513 = vmatmul.bf16.vlgmr.msra.gmra.mxu1 %v86_v38 }
  0x2b   :  { %557 = vmatpush.bf16.msrb.mxu1 %v1166_v34  ;;  %526 = vmatmul.bf16.vlgmr.msra.gmra.mxu2 %v87_v44  ;;  %v666_v34 = vlaneseq }
  0x2c   :  { %577 = vmatpush.bf16.msrb.mxu2 %v1167_v40  ;;  %539 = vmatmul.bf16.vlgmr.msra.gmra.mxu3 %v88_v45 }
  0x2d   :  { %653 = vmatpush.bf16.msrb.mxu3 %v1175_v0  ;;  %v667_v35 = vshrl.u32 %v666_v34, 7  ;;  %v1258_v0 = vmov 0  }
  0x2e   :  { %545 = vmatpush.bf16.msrb.mxu0 %v1157_v42  ;;  %1187 = vset.pattern.permute.xlu1 %v1258_v0 }
  0x2f   :  { %558 = vmatpush.bf16.msrb.mxu1 %v1165_v43  ;;  %vm1407_vm1 = vcmp.lt.s32.totalorder %v667_v35, %v671_v37  ;;  %v1192_v43 = vld [vmem:[%s1467_s7] ss:$0 sm:$0xff]  ;;  %1188 = vset.pattern.permute.xlu2 %v1258_v0 }
  0x30   :  { %699 = vmatpush.msra.mxu2 %v677_v12  ;;  %1189 = vset.pattern.permute.xlu0 %v1258_v0 }
  0x31   :  { %654 = vmatpush.bf16.msrb.mxu3 %v1174_v1 }
  0x32   :  { %546 = vmatpush.bf16.msrb.mxu0 %v1156_v46  ;;  %700 = vmatpush.msra.mxu2 %v676_v13  ;;  %v1193_v46 = vld [vmem:[%s1468_s8] ss:$0 sm:$0xff] }
  0x33   :  { %559 = vmatpush.bf16.msrb.mxu1 %v1164_v47 }
  0x35   :  { %655 = vmatpush.bf16.msrb.mxu3 %v1173_v2 }
  0x36   :  { %547 = vmatpush.bf16.msrb.mxu0 %v1155_v48 }
  0x37   :  { %560 = vmatpush.bf16.msrb.mxu1 %v1163_v49 }
  0x39   :  { %656 = vmatpush.bf16.msrb.mxu3 %v1172_v3 }
  0x3a   :  { %548 = vmatpush.bf16.msrb.mxu0 %v1154_v50  ;;  %v1194_v50 = vld [vmem:[#allocation7] ss:$0 sm:$0xff] }
  0x3b   :  { %561 = vmatpush.bf16.msrb.mxu1 %v1162_v51  ;;  %1083 = vmatmul.msk.bf16.vlgmr.msrb.gmra.mxu2 %vm488_vm0, %v91_v55  ;;  %v1256_v55 = vmov -1e+30  }
  0x3c   :  { %74 = vst.msk [vmem:[#allocation2] sm:$0x1] %vm73_vm4, %v1256_v55  ;;  %v814_v55 = vld [vmem:[%s1471_s11] sm:$0x1] }
  0x3d   :  { %657 = vmatpush.bf16.msrb.mxu3 %v1171_v4 }
  0x3e   :  { %549 = vmatpush.bf16.msrb.mxu0 %v1153_v53 }
  0x3f   :  { %562 = vmatpush.bf16.msrb.mxu1 %v1161_v54 }
  0x41   :  { %658 = vmatpush.bf16.msrb.mxu3 %v1170_v5 }
  0x42   :  { %550 = vmatpush.bf16.msrb.mxu0 %v1152_v56 }
  0x43   :  { %563 = vmatpush.bf16.msrb.mxu1 %v1160_v57  ;;  %v723_v1 = vld [vmem:[#allocation2] sm:$0x1] }
  0x45   :  { %659 = vmatpush.bf16.msrb.mxu3 %v1169_v6 }
  0x46   :  { %551 = vmatpush.bf16.msrb.mxu0 %v1151_v58 }
  0x47   :  { %564 = vmatpush.bf16.msrb.mxu1 %v1159_v59 }
  0x49   :  { %552 = vmatmul.bf16.vlgmr.msrb.gmra.mxu0 %v89_v62  ;;  %660 = vmatpush.bf16.msrb.mxu3 %v1168_v9 }
  0x4a   :  { %565 = vmatmul.bf16.vlgmr.msrb.gmra.mxu1 %v90_v63  ;;  %v1257_v63 = vmov 0.0  }
  0x4b   :  { %75 = vst.msk [vmem:[#allocation3] sm:$0x1] %vm73_vm4, %v1257_v63 }
  0x4c   :  { %77 = vst.msk [vmem:[#allocation4] sm:$0x1] %vm76_vm5, %v1257_v63 }
  0x53   :  { %v761_v37 = vld [vmem:[#allocation4] sm:$0x1] }
  0xa6   :  { %v501_v7 = vpop.f32.mrf.mxu0 }
  0xa7   :  { %v514_v8 = vpop.f32.mrf.mxu1  ;;  %v502_v17 = vadd.f32 %v1190_v16, %v501_v7 }
  0xa9   :  { %v515_v20 = vadd.f32 %v514_v8, %v502_v17 }
  0xae   :  { %v503_v10 = vpop.f32.mrf.mxu0  ;;  %v527_v14 = vpop.f32.mrf.mxu2 }
  0xaf   :  { %v516_v11 = vpop.f32.mrf.mxu1  ;;  %v540_v15 = vpop.f32.mrf.mxu3  ;;  %v528_v21 = vadd.f32 %v527_v14, %v515_v20 }
  0xb1   :  { %v541_v23 = vadd.f32 %v540_v15, %v528_v21 }
  0xb6   :  { %v529_v18 = vpop.f32.mrf.mxu2 }
  0xb7   :  { %v542_v19 = vpop.f32.mrf.mxu3 }
  0xb8   :  { %v745_v19 = vld [vmem:[#allocation3] sm:$0x1] }
  0xbe   :  { %v579_v22 = vpop.f32.mrf.mxu2 }
  0xc6   :  { %v553_v24 = vpop.f32.mrf.mxu0  ;;  %v581_v28 = vpop.f32.mrf.mxu2 }
  0xc7   :  { %v566_v25 = vpop.f32.mrf.mxu1  ;;  %v554_v26 = vadd.f32 %v553_v24, %v541_v23 }
  0xc9   :  { %v567_v27 = vadd.f32 %v566_v25, %v554_v26  ;;  %v813_v26 = vld [vmem:[%s1470_s10 + $0x8] sm:$0xff] }
  0xca   :  { %832 = vmatpush.msrb.mxu2 %v813_v26 }
  0xcb   :  { %v580_v29 = vadd.f32 %v579_v22, %v567_v27  ;;  %v812_v27 = vld [vmem:[%s1470_s10] sm:$0xff] }
  0xcc   :  { %833 = vmatpush.msrb.mxu2 %v812_v27 }
  0xcd   :  { %v583_v30 = vmax.f32 %v580_v29, 0.0 }
  0xce   :  { %v555_v31 = vpop.f32.mrf.mxu0 }
  0xcf   :  { %v568_v32 = vpop.f32.mrf.mxu1  ;;  %v584_v33 = vpack.c.bf16 %v583_v30, %v583_v30  ;;  %v839_v30 = vld [vmem:[%s1472_s12] sm:$0xff] }
  0xd0   :  { %859 = vmatpush.msra.mxu0 %v839_v30 }
  0xd1   :  { %661 = vmatmul.bf16.vlgmr.msrb.gmra.mxu3 %v584_v33 }
 0x154   :  { %v662_v38 = vpop.f32.mrf.mxu3 }
 0x155   :  { %v663_v40 = vadd.f32 %v1191_v36, %v662_v38 }
 0x157   :  { %v1413_v41 = vsel %vm1407_vm1, %v663_v40, 0.0 }
 0x158   :  { %1116 = vmatmul.msk.f32.vlgmr.msra.gmra.mxu2 %vm488_vm0, %v1413_v41 }
 0x15c   :  { %v664_v42 = vpop.f32.mrf.mxu3 }
 0x1db   :  { %v702_v44 = vpop.f32.mrf.mxu2 }
 0x1dc   :  { %v703_v45 = vadd.f32 %v1192_v43, %v702_v44 }
 0x1de   :  { %v705_v47 = vmax.f32 %v703_v45, 0.0 }
 0x1e0   :  { %v710_v48 = vmul.f32 %v1193_v46, %v705_v47 }
 0x1e2   :  { %v712_v49 = vsel %vm711_vm2, %v710_v48, 0.0 }
 0x1e3   :  { %713 = vadd.xlane.f32.xlu0 %v712_v49 }
 0x256   :  { %v714_v51 = vpop.xlane.xlu0 %713 }
 0x257   :  { %v719_v52 = vadd.f32 %v1194_v50, %v714_v51 }
 0x259   :  { %v720_v53 = vsel %vm1407_vm1, %v719_v52, -1e+30 }
 0x25a   :  { %v724_v54 = vsel %vm721_vm3, %v720_v53, -inf  ;;  %722 = vst.msk [vmem:[%s1475_s15] sm:$0xff] %vm721_vm3, %v720_v53 }
 0x25b   :  { %725 = vmax.xlane.f32.xlu0 %v724_v54 }
 0x2ce   :  { %v726_v56 = vpop.xlane.xlu0 %725 }
 0x2cf   :  { %v727_v57 = vrot.slane %v726_v56, 4 }
 0x2d1   :  { %v728_v58 = vmax.f32 %v726_v56, %v727_v57 }
 0x2d3   :  { %v729_v59 = vrot.slane %v728_v58, 2 }
 0x2d5   :  { %v730_v60 = vmax.f32 %v728_v58, %v729_v59  ;;  %v840_v59 = vld [vmem:[%s1473_s13] sm:$0x1] }
 0x2d7   :  { %v731_v61 = vrot.slane %v730_v60, 1 }
 0x2d9   :  { %v732_v62 = vmax.f32 %v730_v60, %v731_v61 }
 0x2db   :  { %1176 = vpush %v732_v62 }
 0x30c   :  { %s1177_s8 = spop %1176 }
 0x30d   :  { %v734_v2 = vstv %s1177_s8 }
 0x30e   :  { %v735_v3 = vmax.f32 %v723_v1, %v734_v2 }
 0x310   :  { %v736_v4 = vsub.f32 %v723_v1, %v735_v3  ;;  %v740_v5 = vperm.slane %v735_v3, 0  ;;  %785 = vst.msk [vmem:[#allocation2] sm:$0x1] %vm73_vm4, %v735_v3 }
 0x312   :  { %v742_v6 = vsub.f32 %v720_v53, %v740_v5  ;;  %v737_v17 = vmul.f32 1.442695, %v736_v4 }
 0x314   :  { %v743_v7 = vmul.f32 1.442695, %v742_v6 }
 0x316   :  { %1195 = vpow2.f32 %v743_v7 }
 0x317   :  { %1197 = vpow2.f32 %v737_v17 }
 0x31c   :  { %v1196_v8 = vpop.eup %1195 }
 0x31d   :  { %v747_v9 = vsel %vm721_vm3, %v1196_v8, 0.0  ;;  %v1198_v18 = vpop.eup %1197 }
 0x31e   :  { %748 = vadd.xlane.f32.xlu1 %v747_v9  ;;  %v746_v20 = vmul.f32 %v1198_v18, %v745_v19 }
 0x337   :  { %771 = vperm.xlu1 %1187, %v1196_v8  }
 0x391   :  { %v749_v10 = vpop.xlane.xlu1 %748 }
 0x392   :  { %v750_v11 = vrot.slane %v749_v10, 4 }
 0x394   :  { %v751_v12 = vadd.f32 %v750_v11, %v749_v10 }
 0x396   :  { %v752_v13 = vrot.slane %v751_v12, 2 }
 0x398   :  { %v753_v14 = vadd.f32 %v752_v13, %v751_v12 }
 0x39a   :  { %v754_v15 = vrot.slane %v753_v14, 1 }
 0x39c   :  { %v755_v16 = vadd.f32 %v754_v15, %v753_v14 }
 0x39e   :  { %1178 = vpush %v755_v16 }
 0x3a9   :  { %v772_v24 = vpop.permute.xlu1 %771 }
 0x3aa   :  { %v774_v25 = vmul.f32 %v772_v24, %v1413_v41 }
 0x3ac   :  { %v775_v28 = vsel %vm488_vm0, %v774_v25, 0.0 }
 0x3ad   :  { %v776_v29 = vrot.slane %v775_v28, 4 }
 0x3af   :  { %v777_v31 = vadd.f32 %v776_v29, %v775_v28 }
 0x3b1   :  { %v778_v32 = vrot.slane %v777_v31, 2 }
 0x3b3   :  { %v779_v35 = vadd.f32 %v778_v32, %v777_v31 }
 0x3b5   :  { %v780_v36 = vrot.slane %v779_v35, 1 }
 0x3b7   :  { %v781_v42 = vadd.f32 %v780_v36, %v779_v35 }
 0x3cf   :  { %s1179_s15 = spop %1178 }
 0x3d0   :  { %v757_v21 = vstv %s1179_s15 }
 0x3d1   :  { %v758_v22 = vadd.f32 %v757_v21, %v746_v20 }
 0x3d3   :  { %760 = vst.msk [vmem:[#allocation3] sm:$0x1] %vm73_vm4, %v758_v22 }
 0x3da   :  { %v790_v23 = vld [vmem:[#allocation3] sm:$0x1] }
 0x3db   :  { %793 = vperm.xlu2 %1188, %v790_v23  }
 0x3e3   :  { %764 = vperm.xlu2 %1188, %v1198_v18  }
 0x435   :  { %v794_v33 = vpop.permute.xlu2 %793 }
 0x436   :  { %v796_v34 = vperm.slane %v794_v33, 0 }
 0x438   :  { %1199 = vrcp.f32 %v796_v34  ;;  %v808_v48 = vand.u32 2147483648, %v796_v34  ;;  %vm802_vm7 = vweird.f32 %v796_v34  ;;  %v806_v49 = vand.u32 2147483647, %v796_v34 }
 0x43a   :  { %v809_v51 = vor.u32 1.1754944e-38, %v808_v48  ;;  %vm807_vm9 = vcmp.eq.f32.partialorder %v806_v49, 8.507059e+37 }
 0x43d   :  { %v765_v38 = vpop.permute.xlu2 %764 }
 0x43e   :  { %v1200_v39 = vpop.eup %1199  ;;  %v767_v40 = vperm.slane %v765_v38, 0 }
 0x43f   :  { %v798_v41 = vmul.f32 %v1200_v39, %v796_v34  ;;  %vm803_vm6 = vweird.f32 %v1200_v39 }
 0x440   :  { %v768_v43 = vmul.f32 %v767_v40, %v761_v37  ;;  %vm804_vm8 = vmor %vm802_vm7, %vm803_vm6 }
 0x441   :  { %v799_v44 = vsub.f32 1.0, %v798_v41 }
 0x442   :  { %v782_v45 = vadd.f32 %v781_v42, %v768_v43 }
 0x443   :  { %v800_v46 = vmul.f32 %v1200_v39, %v799_v44 }
 0x444   :  { %784 = vst.msk [vmem:[#allocation4] sm:$0x1] %vm76_vm5, %v782_v45 }
 0x445   :  { %v801_v47 = vadd.f32 %v1200_v39, %v800_v46 }
 0x447   :  { %v805_v50 = vsel %vm804_vm8, %v1200_v39, %v801_v47 }
 0x448   :  { %v810_v53 = vsel %vm807_vm9, %v809_v51, %v805_v50 }
 0x44b   :  { %v789_v52 = vld [vmem:[#allocation4] sm:$0x1] }
 0x44c   :  { %v811_v54 = vmul.f32 %v810_v53, %v789_v52 }
 0x44e   :  { %1117 = vmatmul.msk.f32.vlgmr.msrb.gmra.mxu2 %vm488_vm0, %v811_v54 }
 0x4d1   :  { %v835_v56 = vpop.f32.mrf.mxu2 }
 0x4d2   :  { %v836_v57 = vadd.f32 %v835_v56, %v814_v55 }
 0x4d4   :  { %v838_v58 = vmax.f32 %v836_v57, 0.0 }
 0x4d6   :  { %1118 = vmatmul.msk.f32.vlgmr.msra.gmra.mxu0 %vm711_vm2, %v838_v58 }
 0x553   :  { %v861_v60 = vpop.f32.mrf.mxu0 }
 0x554   :  { %v862_v61 = vadd.f32 %v861_v60, %v840_v59 }
 0x556   :  { %865 = vst.msk [vmem:[#allocation11] sm:$0x1] %vm864_vm10, %v862_v61 }
 0x557   :  { %876 = dma.vmem_to_hbm [thread:$0]  %s872_s23, 16, %s874_s26, [#allocation10]  }
 0x558   :  { %1251 = dma.done.wait [#allocation10], 16  }
 0x559   :  { %1252 = vsyncadd [#allocation10], 4294967280 }
 0x55a   :  { %885 = vsyncpa [#allocation9], 1 }
 0x55b   :  { %886 = vsyncpa [#allocation10], 1 }

</bundles_post_ra>
